<compile_context>
chip_gen: v7x
topology: tpu7x:2x2x1
jax: 0.10.0
libtpu: 0.0.40
codegen_flags: <defaults>
</compile_context>

<pallas_src>
import jax
import jax.numpy as jnp
from jax import lax
from jax.experimental import pallas as pl
from jax.experimental.pallas import tpu as pltpu
import numpy as np

# ---- problem sizes (small, consistent with the module) ----
N, CIN, COUT = 2, 4, 8
H = W = 16
KH = KW = 3
STRIDE = 1
PAD = 1
HW = H * W
KDIM = KH * KW * CIN


def conv_tsa_kernel(xcol_ref, w_ref, b_ref, o_ref):
    """One batch element per grid step.

    xcol_ref: (1, KDIM, HW)   im2col activations, (kh,kw,c)-major rows, spatial on lanes
    w_ref   : (COUT, KDIM)    frozen 3x3 weight with alpha folded into the centre tap
    b_ref   : (COUT, 1)       conv bias (broadcasts over the lane axis)
    o_ref   : (1, COUT, HW)   output (NCHW with flattened spatial -> lane-dense store)
    """
    acc = jnp.dot(w_ref[...], xcol_ref[0], preferred_element_type=jnp.float32)
    acc += b_ref[...]                                   # (COUT, 1) broadcasts over HW lanes
    o_ref[0] = acc.astype(o_ref.dtype)


@jax.jit
def conv_tsa_forward(x_nchw, w_oihw, bias, alpha_oi11):
    """Wrapper: NCHW in / NCHW out, matching the PyTorch module."""
    n, c_in, h, w = x_nchw.shape
    c_out = w_oihw.shape[0]
    hw = h * w
    kdim = KH * KW * c_in

    # ---- weight prep (pure glue) ----
    # Fold the 1x1 alpha adapter into the centre tap of the frozen 3x3 conv.
    # Exact for stride=1, padding=1: the (PAD, PAD) tap reads x[i, j].
    w_eff = w_oihw.at[:, :, PAD, PAD].add(alpha_oi11[:, :, 0, 0])       # (Cout, Cin, KH, KW)
    # w_col rows ordered (kh, kw, c) to match the im2col activation layout below.
    w_col = jnp.transpose(w_eff, (0, 2, 3, 1)).reshape(c_out, kdim)     # (Cout, KH*KW*Cin)
    bias_col = bias.reshape(c_out, 1)

    # ---- im2col in the wrapper (XLA) so the kernel is one clean matmul ----
    x_pad = jnp.pad(x_nchw, ((0, 0), (0, 0), (PAD, PAD), (PAD, PAD)))   # (N, Cin, H+2, W+2)
    patches = jnp.stack(
        [x_pad[:, :, kh:kh + h, kw:kw + w] for kh in range(KH) for kw in range(KW)],
        axis=1)                                                          # (N, 9, Cin, H, W)
    x_col = patches.reshape(n, kdim, hw)                                 # (N, 36, H*W)

    out = pl.pallas_call(
        conv_tsa_kernel,
        out_shape=jax.ShapeDtypeStruct((n, c_out, hw), x_nchw.dtype),
        grid_spec=pltpu.PrefetchScalarGridSpec(
            num_scalar_prefetch=0,
            grid=(n,),
            in_specs=[
                pl.BlockSpec((1, kdim, hw), lambda b: (b, 0, 0)),
                pl.BlockSpec((c_out, kdim), lambda b: (0, 0)),
                pl.BlockSpec((c_out, 1), lambda b: (0, 0)),
            ],
            out_specs=pl.BlockSpec((1, c_out, hw), lambda b: (b, 0, 0)),
        ),
        compiler_params=pltpu.CompilerParams(dimension_semantics=("parallel",)),
    )(x_col, w_col, bias_col)

    # Output is already NCHW with flattened spatial: a free contiguous reshape, no transpose.
    return out.reshape(n, c_out, h, w)


def reference_forward(x_nchw, w_oihw, bias, alpha_oi11):
    """Pure-JAX reference (mirrors the PyTorch forward exactly, in NCHW)."""
    dn = lax.conv_dimension_numbers(x_nchw.shape, w_oihw.shape, ("NCHW", "OIHW", "NCHW"))
    y = lax.conv_general_dilated(x_nchw, w_oihw, (STRIDE, STRIDE),
                                 ((PAD, PAD), (PAD, PAD)), dimension_numbers=dn)
    y = y + bias.reshape(1, -1, 1, 1)
    y = y + lax.conv_general_dilated(x_nchw, alpha_oi11, (STRIDE, STRIDE),
                                     "VALID", dimension_numbers=dn)
    return y


if __name__ == "__main__":
    key = jax.random.PRNGKey(0)
    k_x, k_w, k_b = jax.random.split(key, 3)

    # inputs / frozen conv parameters (deterministic)
    x = jax.random.normal(k_x, (N, CIN, H, W), dtype=jnp.float32)        # NCHW like PyTorch
    conv_w = jax.random.normal(k_w, (COUT, CIN, KH, KW), dtype=jnp.float32) * 0.1
    conv_b = jax.random.normal(k_b, (COUT,), dtype=jnp.float32) * 0.1
    # alpha initialized to ones, exactly as in conv_tsa.__init__
    alpha = jnp.ones((COUT, CIN, 1, 1), dtype=jnp.float32)

    y = conv_tsa_forward(x, conv_w, conv_b, alpha)
    y = jax.block_until_ready(y)

    y_ref = jax.block_until_ready(reference_forward(x, conv_w, conv_b, alpha))
    assert y.shape == (N, COUT, H, W)
    np.testing.assert_allclose(np.asarray(y), np.asarray(y_ref), rtol=1e-5, atol=1e-5)

    print("KERNEL_OK")
</pallas_src>

<mosaic_0001>
module attributes {stable_mosaic.version = 11 : i64} {
  func.func @conv_tsa_kernel(%arg0: i32, %arg1: memref<1x36x256xf32, #tpu.memory_space<vmem>>, %arg2: memref<8x36xf32, #tpu.memory_space<vmem>>, %arg3: memref<8x1xf32, #tpu.memory_space<vmem>>, %arg4: memref<1x8x256xf32, #tpu.memory_space<vmem>>) attributes {dimension_semantics = [#tpu.dimension_semantics<parallel>], iteration_bounds = array<i64: 2>, scalar_prefetch = 0 : i64, scratch_operands = 0 : i64, tpu.core_type = #tpu.core_type<tc>, window_params = [{transform_indices = @transform_0, window_bounds = array<i64: 1, 36, 256>}, {pipeline_mode = #tpu.pipeline_mode<synchronous>, transform_indices = @transform_1, window_bounds = array<i64: 8, 36>}, {pipeline_mode = #tpu.pipeline_mode<synchronous>, transform_indices = @transform_2, window_bounds = array<i64: 8, 1>}, {transform_indices = @transform_3, window_bounds = array<i64: 1, 8, 256>}]} {
    %c0 = arith.constant 0 : index
    %c0_0 = arith.constant 0 : index
    %0 = vector.load %arg2[%c0, %c0_0] : memref<8x36xf32, #tpu.memory_space<vmem>>, vector<8x36xf32>
    %c0_1 = arith.constant 0 : index
    %c0_2 = arith.constant 0 : index
    %c0_3 = arith.constant 0 : index
    %1 = vector.load %arg1[%c0_1, %c0_2, %c0_3] : memref<1x36x256xf32, #tpu.memory_space<vmem>>, vector<1x36x256xf32>
    %2 = vector.shape_cast %1 : vector<1x36x256xf32> to vector<36x256xf32>
    %cst = arith.constant dense<0.000000e+00> : vector<8x256xf32>
    %3 = tpu.matmul %0, %2, %cst {dimension_numbers = #tpu.dot_dimension_numbers<[1], [0], [0], [1], [0, 0, 1, 1], [], []>} : vector<8x36xf32>, vector<36x256xf32>, vector<8x256xf32> -> vector<8x256xf32>
    %c0_4 = arith.constant 0 : index
    %c0_5 = arith.constant 0 : index
    %4 = vector.load %arg3[%c0_4, %c0_5] : memref<8x1xf32, #tpu.memory_space<vmem>>, vector<8x1xf32>
    %5 = vector.broadcast %4 : vector<8x1xf32> to vector<8x256xf32>
    %6 = arith.addf %3, %5 : vector<8x256xf32>
    %c0_6 = arith.constant 0 : index
    %c0_7 = arith.constant 0 : index
    %c0_8 = arith.constant 0 : index
    %7 = vector.load %arg4[%c0_6, %c0_7, %c0_8] : memref<1x8x256xf32, #tpu.memory_space<vmem>>, vector<1x8x256xf32>
    %8 = vector.shape_cast %7 : vector<1x8x256xf32> to vector<8x256xf32>
    %9 = vector.shape_cast %6 : vector<8x256xf32> to vector<1x8x256xf32>
    tpu.vector_store %arg4[%c0_6, %c0_7, %c0_8], %9 {strides = array<i32>} : memref<1x8x256xf32, #tpu.memory_space<vmem>>, vector<1x8x256xf32>,
    return
  }
  func.func @transform_0(%arg0: i32) -> (i32, i32, i32) {
    %c0_i32 = arith.constant 0 : i32
    %c0_i32_0 = arith.constant 0 : i32
    %c0_i32_1 = arith.constant 0 : i32
    return %arg0, %c0_i32, %c0_i32_0 : i32, i32, i32
  }
  func.func @transform_1(%arg0: i32) -> (i32, i32) {
    %c0_i32 = arith.constant 0 : i32
    %c0_i32_0 = arith.constant 0 : i32
    %c0_i32_1 = arith.constant 0 : i32
    return %c0_i32, %c0_i32_0 : i32, i32
  }
  func.func @transform_2(%arg0: i32) -> (i32, i32) {
    %c0_i32 = arith.constant 0 : i32
    %c0_i32_0 = arith.constant 0 : i32
    %c0_i32_1 = arith.constant 0 : i32
    return %c0_i32, %c0_i32_0 : i32, i32
  }
  func.func @transform_3(%arg0: i32) -> (i32, i32, i32) {
    %c0_i32 = arith.constant 0 : i32
    %c0_i32_0 = arith.constant 0 : i32
    %c0_i32_1 = arith.constant 0 : i32
    return %arg0, %c0_i32, %c0_i32_0 : i32, i32, i32
  }
}

</mosaic_0001>

<bundles_post_ra>
// kernel: conv_tsa_forward.1
= control target key start
LH: loop header
LB: loop body
LE: loop exit
PB: predicated region body
PF: predicated region fallthrough
CT: control target
= control target key end

     0   :  { %s391_s12 = smov 0   ;;  %s418_s0 = inlined_call_operand.vmem [shape: f32[2,36,256], index: 0, kind: input, shape index: {}]   ;;  %s419_s1 = inlined_call_operand.vmem [shape: f32[8,36], index: 1, kind: input, shape index: {}]   ;;  %s420_s2 = inlined_call_operand.vmem [shape: f32[8,1], index: 2, kind: input, shape index: {}]   ;;  %s421_s3 = inlined_call_operand.vmem [shape: f32[2,8,256], index: 3, kind: output, shape index: {}]  }
   0x1 LB: > { %s327_s13 = sadd.s32 4294967295, %s367_s12   ;;  %p331_p0 = scmp.ge.s32.totalorder %s367_s12, 1  ;;  %s367_s12 = sphi %s391_s12, %s13_s12  }
   0x2   : > { %p137_p1 = scmp.lt.s32.totalorder %s367_s12, 3 }
   0x4   : > { %p138_p2 = pnand %p331_p0, %p137_p1 }
   0x5   : > { %p161_p3 = scmp.lt.s32.totalorder (!%p138_p2), %s327_s13, 1  ;;  %v369_v0 = vmov (!%p138_p2), 0.0   ;;  %v370_v1 = vmov (!%p138_p2), 0   ;;  %v182_v2 = vld [vmem:[%s420_s2] sm:$0xff] (!%p138_p2)  ;;  %vm192_vm0 = vcmask (!%p138_p2), 1043456   ;;  %vm188_vm1 = vcmask (!%p138_p2), 293888  }
   0x6   : > { %141 = sbr.rel (%p138_p2) target bundleno = 246 (0xf6), region = 32  ;;  %263 = vmatprep.mubr.f32.mxu0 (!%p138_p2), %v369_v0  ;;  %360 = vset.pattern.permute.xlu0 (!%p138_p2), %v370_v1  ;;  %v171_v17 = vld [vmem:[%s419_s1] sm:$0xff] (!%p138_p2) }
   0x7   : > { %185 = vperm.xlu0 (!%p138_p2), %360, %v182_v2  }
   0xd   : > { %s423_s13 = smov (!%p161_p3, %s327_s13), 1 }
   0xe   : > { %s349_s16 = smul.u32 80, %s423_s13  ;;  %s340_s22 = sshll.u32 %s423_s13, 4 }
   0xf   : > { %s170_s25 = scalar_lea.vmem %s421_s3, %s340_s22 }
  0x10   : > { %s165_s19 = scalar_lea.vmem %s418_s0, %s349_s16 }
  0x11   : > { %v173_v3 = vld [vmem:[%s165_s19 + $0x8] sm:$0xff]  ;;  %v175_v4 = vld [vmem:[%s165_s19 + $0x18] sm:$0xff]  ;;  %v172_v5 = vld [vmem:[%s165_s19] sm:$0xff] }
  0x12   : > { %v341_v6 = vpack.c.bf16 %v175_v4, %v173_v3  ;;  %v174_v7 = vld [vmem:[%s165_s19 + $0x10] sm:$0xff]  ;;  %v177_v8 = vld [vmem:[%s165_s19 + $0x28] sm:$0xff]  ;;  %v179_v9 = vld [vmem:[%s165_s19 + $0x38] sm:$0xff] }
  0x13   : > { %v343_v10 = vpack.c.bf16 %v174_v7, %v172_v5  ;;  %v345_v11 = vpack.c.bf16 %v179_v9, %v177_v8  ;;  %v176_v12 = vld [vmem:[%s165_s19 + $0x20] sm:$0xff]  ;;  %v178_v13 = vld [vmem:[%s165_s19 + $0x30] sm:$0xff]  ;;  %v181_v15 = vld [vmem:[%s165_s19 + $0x48] sm:$0xf] }
  0x14   : > { %342 = vmatprep.subr.bf16.mxu0 %v341_v6  ;;  %v347_v14 = vpack.c.bf16 %v178_v13, %v176_v12  ;;  %v180_v16 = vld [vmem:[%s165_s19 + $0x40] sm:$0xf] }
  0x15   : > { %344 = vmatpush1.bf16.msra.mxu0 %v343_v10 }
  0x16   : > { %346 = vmatprep.subr.bf16.mxu0 %v345_v11 }
  0x19   : > { %348 = vmatpush1.bf16.msra.mxu0 %v347_v14 }
  0x1a   : > { %335 = vmatprep.subr.msk.mxu0 %vm192_vm0, %v181_v15 }
  0x1d   : > { %336 = vmatpush1.msk.msra.mxu0 %vm192_vm0, %v180_v16 }
  0x1e   : > { %337 = vmatmul.mubr.msk.f32.vlgmr.msra.gmra.mrb[0].mxu0 %vm188_vm1, %v171_v17 }
  0x86   : > { %v186_v18 = vpop.permute.xlu0 %185 }
  0xf1   : > { %v265_v19 = vpop.f32.mrb[0].mxu0 }
  0xf2   : > { %v266_v20 = vadd.f32 %v265_v19, %v186_v18  ;;  %v267_v21 = vpop.f32.mrb[1].mxu0 }
  0xf3   : > { %v268_v22 = vadd.f32 %v267_v21, %v186_v18 }
  0xf4   : > { %270 = vst [vmem:[%s170_s25] sm:$0xff] %v266_v20 }
  0xf5   : > { %271 = vst [vmem:[%s170_s25 + $0x8] sm:$0xff] %v268_v22 }
  0xf6 PF: > { %s13_s12 = sadd.s32 1, %s367_s12  }
  0xf7   : > { %p10_p4 = scmp.ge.s32.totalorder %s13_s12, 4  }
  0xf9   :  { %12 = sbr.rel (!%p10_p4) target bundleno = 1 (0x1), region = 62 }

</bundles_post_ra>
